<compile_context>
chip_gen: v6e
topology: v6e:2x2x1
jax: 0.10.0
libtpu: 0.0.40
codegen_flags: <defaults>
</compile_context>

<pallas_src>
import functools

import jax
import jax.numpy as jnp
from jax import lax
from jax.experimental import pallas as pl
from jax.experimental.pallas import tpu as pltpu

LN_EPS = 1e-5                      # torch nn.LayerNorm default
COMPUTE_DTYPE = jnp.bfloat16       # MXU-friendly storage dtype for weights/activations


def _layernorm_f32(x_f32, w, b):
    # CLIP LayerNorm: statistics and affine in fp32.
    mu = jnp.mean(x_f32, axis=-1, keepdims=True)
    var = jnp.mean((x_f32 - mu) ** 2, axis=-1, keepdims=True)
    y = (x_f32 - mu) * lax.rsqrt(var + LN_EPS)
    return y * w.astype(jnp.float32) + b.astype(jnp.float32)


# ---------------------------------------------------------------------------
# Kernel 1: patch embedding (conv-as-matmul) + cls token + pos embed + ln_pre
# ---------------------------------------------------------------------------
def embed_kernel(patches_ref, wconv_ref, cls_ref, pos_ref, lnw_ref, lnb_ref, out_ref):
    # patches_ref: (L, P) bf16   wconv_ref: (P, D) bf16
    # cls_ref: (1, D)            pos_ref: (L+1, D)      out_ref: (S_pad, D) bf16
    L = patches_ref.shape[0]
    S_pad, D = out_ref.shape
    lnw = lnw_ref[...]
    lnb = lnb_ref[...]

    # Conv2d(kernel=p, stride=p, bias=False) == patches @ Wconv  (f32 accumulation)
    x = jnp.dot(patches_ref[...], wconv_ref[...], preferred_element_type=jnp.float32)
    x = x + pos_ref[1:L + 1, :].astype(jnp.float32)                       # (L, D)
    c = cls_ref[...].astype(jnp.float32) + pos_ref[0:1, :].astype(jnp.float32)

    # No concatenate: zero pad rows, then two stores.
    if S_pad > L + 1:
        out_ref[L + 1:, :] = jnp.zeros((S_pad - L - 1, D), out_ref.dtype)
    out_ref[0:1, :] = _layernorm_f32(c, lnw, lnb).astype(out_ref.dtype)
    out_ref[1:L + 1, :] = _layernorm_f32(x, lnw, lnb).astype(out_ref.dtype)


# ---------------------------------------------------------------------------
# Kernel 2: one ResidualAttentionBlock (non-flash path: nn.MultiheadAttention)
# ---------------------------------------------------------------------------
def block_kernel(x_ref, ln1w, ln1b, wqkv, bqkv, wo, bo, ln2w, ln2b,
                 wfc, bfc, wproj, bproj, out_ref, attn_scratch,
                 *, n_head, s_valid):
    x = x_ref[...].astype(jnp.float32)            # (S_pad, D) residual stream in f32
    S, D = x.shape
    hd = D // n_head
    scale = 1.0 / (hd ** 0.5)

    # --- attention branch ---
    y = _layernorm_f32(x, ln1w[...], ln1b[...]).astype(COMPUTE_DTYPE)
    # Fused QKV: one (S, D) @ (D, 3D) MXU pass, f32 accumulation.
    qkv = jnp.dot(y, wqkv[...], preferred_element_type=jnp.float32)
    qkv = qkv + bqkv[...].astype(jnp.float32)                              # (S, 3D)
    q = (qkv[:, 0:D] * scale).astype(COMPUTE_DTYPE)
    k = qkv[:, D:2 * D].astype(COMPUTE_DTYPE)
    v = qkv[:, 2 * D:3 * D].astype(COMPUTE_DTYPE)

    # Pad-key mask (static: only built when the sequence was padded).
    if S > s_valid:
        key_valid = lax.broadcasted_iota(jnp.int32, (S, S), 1) < s_valid
    else:
        key_valid = None

    for h in range(n_head):                        # static unroll over heads
        sl = slice(h * hd, (h + 1) * hd)
        qh, kh, vh = q[:, sl], k[:, sl], v[:, sl]
        # q @ k^T without a materialized transpose: contract both on last dim.
        s = lax.dot_general(qh, kh, (((1,), (1,)), ((), ())),
                            preferred_element_type=jnp.float32)            # (S, S)
        if key_valid is not None:
            s = jnp.where(key_valid, s, -1e30)
        s = s - jnp.max(s, axis=-1, keepdims=True)
        e = jnp.exp(s)
        a = (e * pl.reciprocal(jnp.sum(e, axis=-1, keepdims=True),
                               approx=True)).astype(COMPUTE_DTYPE)
        # Head output goes straight into its lane slice of the scratch (no concat).
        attn_scratch[:, sl] = jnp.dot(a, vh, preferred_element_type=jnp.float32)

    attn = attn_scratch[...].astype(COMPUTE_DTYPE)                          # (S, D)
    attn = jnp.dot(attn, wo[...], preferred_element_type=jnp.float32) \
        + bo[...].astype(jnp.float32)
    x = x + attn

    # --- MLP branch ---
    y = _layernorm_f32(x, ln2w[...], ln2b[...]).astype(COMPUTE_DTYPE)
    h1 = jnp.dot(y, wfc[...], preferred_element_type=jnp.float32) \
        + bfc[...].astype(jnp.float32)
    h1 = (h1 * jax.nn.sigmoid(1.702 * h1)).astype(COMPUTE_DTYPE)            # QuickGELU in f32
    m = jnp.dot(h1, wproj[...], preferred_element_type=jnp.float32) \
        + bproj[...].astype(jnp.float32)
    x = x + m

    out_ref[...] = x.astype(out_ref.dtype)


# ---------------------------------------------------------------------------
# Kernel 3: ln_post
# ---------------------------------------------------------------------------
def ln_kernel(x_ref, w_ref, b_ref, out_ref):
    out_ref[...] = _layernorm_f32(x_ref[...].astype(jnp.float32),
                                  w_ref[...], b_ref[...]).astype(out_ref.dtype)


# ---------------------------------------------------------------------------
# pallas_call wrappers
# ---------------------------------------------------------------------------
def _const_spec(shape):
    zeros = (0,) * len(shape)
    return pl.BlockSpec(shape, lambda b: zeros)


def _seq_spec(S, D):
    return pl.BlockSpec((None, S, D), lambda b: (b, 0, 0))


def embed_call(patches, wconv, cls, pos, lnw, lnb, s_pad):
    B, L, P = patches.shape
    D = wconv.shape[1]
    return pl.pallas_call(
        embed_kernel,
        out_shape=jax.ShapeDtypeStruct((B, s_pad, D), COMPUTE_DTYPE),
        grid=(B,),
        in_specs=[
            pl.BlockSpec((None, L, P), lambda b: (b, 0, 0)),
            _const_spec(wconv.shape),
            _const_spec(cls.shape),
            _const_spec(pos.shape),
            _const_spec(lnw.shape),
            _const_spec(lnb.shape),
        ],
        out_specs=_seq_spec(s_pad, D),
        compiler_params=pltpu.CompilerParams(dimension_semantics=("parallel",)),
    )(patches, wconv, cls, pos, lnw, lnb)


def block_call(x, layer_params, n_head, s_valid):
    B, S, D = x.shape
    args = [x] + list(layer_params)
    in_specs = [_seq_spec(S, D)] + [_const_spec(p.shape) for p in layer_params]

    itemsize = jnp.dtype(COMPUTE_DTYPE).itemsize
    weight_bytes = sum(int(p.size) for p in layer_params) * itemsize
    cost = pl.CostEstimate(
        flops=int(B * (24 * S * D * D + 4 * S * S * D)),
        transcendentals=int(B * (n_head * S * S + 4 * S * D)),
        bytes_accessed=int(weight_bytes + 2 * B * S * D * itemsize),
    )
    return pl.pallas_call(
        functools.partial(block_kernel, n_head=n_head, s_valid=s_valid),
        out_shape=jax.ShapeDtypeStruct((B, S, D), COMPUTE_DTYPE),
        grid=(B,),
        in_specs=in_specs,
        out_specs=_seq_spec(S, D),
        scratch_shapes=[pltpu.VMEM((S, D), jnp.float32)],   # per-head attention output slab
        compiler_params=pltpu.CompilerParams(dimension_semantics=("parallel",)),
        cost_estimate=cost,
    )(*args)


def ln_call(x, w, b):
    B, S, D = x.shape
    return pl.pallas_call(
        ln_kernel,
        out_shape=jax.ShapeDtypeStruct((B, S, D), jnp.float32),
        grid=(B,),
        in_specs=[_seq_spec(S, D), _const_spec(w.shape), _const_spec(b.shape)],
        out_specs=_seq_spec(S, D),
        compiler_params=pltpu.CompilerParams(dimension_semantics=("parallel",)),
    )(x, w, b)


# ---------------------------------------------------------------------------
# VisionTransformer forward
# ---------------------------------------------------------------------------
def vit_forward(x_nchw, params, patch_size, n_head):
    # Input is NCHW (B, C, H, W), exactly like the PyTorch module.
    B, C, H, W = x_nchw.shape
    p = patch_size
    gh, gw = H // p, W // p
    L = gh * gw
    s_valid = L + 1
    s_pad = ((s_valid + 7) // 8) * 8    # sublane-align the sequence; pad keys masked in-kernel

    # Patch extraction (glue): (B, C, gh, p, gw, p) -> (B, L, C*p*p), cast to bf16 for the MXU.
    patches = (x_nchw.reshape(B, C, gh, p, gw, p)
               .transpose(0, 2, 4, 1, 3, 5)
               .reshape(B, L, C * p * p)).astype(COMPUTE_DTYPE)

    x = embed_call(patches, params["wconv"], params["cls"], params["pos"],
                   params["ln_pre_w"], params["ln_pre_b"], s_pad)
    # (torch runs the transformer seq-first (S, B, D); math is identical in this
    #  batch-first (B, S, D) layout)
    for layer_params in params["layers"]:
        x = block_call(x, layer_params, n_head, s_valid)
    x = ln_call(x, params["ln_post_w"], params["ln_post_b"])
    return x[:, :s_valid, :]   # drop pad rows; == ln_post(x.permute(1,0,2)) in torch


# ---------------------------------------------------------------------------
# Deterministic parameter construction (bf16 storage)
# ---------------------------------------------------------------------------
def make_params(key, *, in_channels, patch_size, input_resolution, width, layers, heads,
                dtype=COMPUTE_DTYPE):
    D = width
    P = in_channels * patch_size * patch_size
    L = (input_resolution // patch_size) ** 2
    scale = D ** (-0.5)
    std = 0.02

    keys = iter(jax.random.split(key, 3 + 4 * layers))

    def rnd(k, shape, s):
        return (s * jax.random.normal(k, shape, jnp.float32)).astype(dtype)

    params = {
        # conv1 weight (D, C, p, p) stored flattened & transposed -> (C*p*p, D)
        "wconv": rnd(next(keys), (P, D), std),
        "cls": rnd(next(keys), (1, D), scale),
        "pos": rnd(next(keys), (L + 1, D), scale),
        "ln_pre_w": jnp.ones((1, D), dtype),
        "ln_pre_b": jnp.zeros((1, D), dtype),
        "ln_post_w": jnp.ones((1, D), dtype),
        "ln_post_b": jnp.zeros((1, D), dtype),
        "layers": [],
    }

    for _ in range(layers):
        layer = (
            jnp.ones((1, D), dtype),             # ln_1.weight
            jnp.zeros((1, D), dtype),            # ln_1.bias
            rnd(next(keys), (D, 3 * D), std),    # attn in_proj (q|k|v fused), pre-transposed
            jnp.zeros((1, 3 * D), dtype),        # attn in_proj bias
            rnd(next(keys), (D, D), std),        # attn out_proj.weight, pre-transposed
            jnp.zeros((1, D), dtype),            # attn out_proj.bias
            jnp.ones((1, D), dtype),             # ln_2.weight
            jnp.zeros((1, D), dtype),            # ln_2.bias
            rnd(next(keys), (D, 4 * D), std),    # mlp.c_fc.weight, pre-transposed
            jnp.zeros((1, 4 * D), dtype),        # mlp.c_fc.bias
            rnd(next(keys), (4 * D, D), std),    # mlp.c_proj.weight, pre-transposed
            jnp.zeros((1, D), dtype),            # mlp.c_proj.bias
        )
        params["layers"].append(layer)
    return params


# TODO(synk): optional branches of the torch module (modulation_fn, cross-attention,
# zero_convs, flash_v2 / shift_group, additional_residuals, num_views reshape,
# return_all_layers) are not taken in the default config and are not implemented here.

if __name__ == "__main__":
    # Small, module-consistent shapes.
    B, C = 2, 3
    input_resolution = 16
    patch_size = 8
    width = 32
    layers = 2
    heads = 4

    key = jax.random.PRNGKey(0)
    k_x, k_p = jax.random.split(key)
    x = jax.random.normal(k_x, (B, C, input_resolution, input_resolution), jnp.float32)
    params = make_params(k_p, in_channels=C, patch_size=patch_size,
                         input_resolution=input_resolution, width=width,
                         layers=layers, heads=heads)

    out = vit_forward(x, params, patch_size, heads)
    out = jax.block_until_ready(out)

    expected_seq = (input_resolution // patch_size) ** 2 + 1
    assert out.shape == (B, expected_seq, width), out.shape
    assert bool(jnp.all(jnp.isfinite(out)))
    print("KERNEL_OK")
</pallas_src>

<mosaic_0001>
module attributes {stable_mosaic.version = 11 : i64} {
  func.func @embed_kernel(%arg0: i32, %arg1: memref<1x4x192xbf16, #tpu.memory_space<vmem>>, %arg2: memref<192x32xbf16, #tpu.memory_space<vmem>>, %arg3: memref<1x32xbf16, #tpu.memory_space<vmem>>, %arg4: memref<5x32xbf16, #tpu.memory_space<vmem>>, %arg5: memref<1x32xbf16, #tpu.memory_space<vmem>>, %arg6: memref<1x32xbf16, #tpu.memory_space<vmem>>, %arg7: memref<1x8x32xbf16, #tpu.memory_space<vmem>>) attributes {dimension_semantics = [#tpu.dimension_semantics<parallel>], iteration_bounds = array<i64: 2>, scalar_prefetch = 0 : i64, scratch_operands = 0 : i64, tpu.core_type = #tpu.core_type<tc>, window_params = [{transform_indices = @transform_0, window_bounds = array<i64: 1, 4, 192>}, {pipeline_mode = #tpu.pipeline_mode<synchronous>, transform_indices = @transform_1, window_bounds = array<i64: 192, 32>}, {pipeline_mode = #tpu.pipeline_mode<synchronous>, transform_indices = @transform_2, window_bounds = array<i64: 1, 32>}, {pipeline_mode = #tpu.pipeline_mode<synchronous>, transform_indices = @transform_3, window_bounds = array<i64: 5, 32>}, {pipeline_mode = #tpu.pipeline_mode<synchronous>, transform_indices = @transform_4, window_bounds = array<i64: 1, 32>}, {pipeline_mode = #tpu.pipeline_mode<synchronous>, transform_indices = @transform_5, window_bounds = array<i64: 1, 32>}, {transform_indices = @transform_6, window_bounds = array<i64: 1, 8, 32>}]} {
    %c0 = arith.constant 0 : index
    %c0_0 = arith.constant 0 : index
    %0 = vector.load %arg5[%c0, %c0_0] : memref<1x32xbf16, #tpu.memory_space<vmem>>, vector<1x32xbf16>
    %c0_1 = arith.constant 0 : index
    %c0_2 = arith.constant 0 : index
    %1 = vector.load %arg6[%c0_1, %c0_2] : memref<1x32xbf16, #tpu.memory_space<vmem>>, vector<1x32xbf16>
    %c0_3 = arith.constant 0 : index
    %c0_4 = arith.constant 0 : index
    %c0_5 = arith.constant 0 : index
    %2 = vector.load %arg1[%c0_3, %c0_4, %c0_5] : memref<1x4x192xbf16, #tpu.memory_space<vmem>>, vector<1x4x192xbf16>
    %3 = vector.shape_cast %2 : vector<1x4x192xbf16> to vector<4x192xbf16>
    %c0_6 = arith.constant 0 : index
    %c0_7 = arith.constant 0 : index
    %4 = vector.load %arg2[%c0_6, %c0_7] : memref<192x32xbf16, #tpu.memory_space<vmem>>, vector<192x32xbf16>
    %cst = arith.constant dense<0.000000e+00> : vector<4x32xf32>
    %5 = tpu.matmul %3, %4, %cst {dimension_numbers = #tpu.dot_dimension_numbers<[1], [0], [0], [1], [0, 0, 1, 1], [], []>} : vector<4x192xbf16>, vector<192x32xbf16>, vector<4x32xf32> -> vector<4x32xf32>
    %c1 = arith.constant 1 : index
    %c0_8 = arith.constant 0 : index
    %6 = vector.load %arg4[%c1, %c0_8] : memref<5x32xbf16, #tpu.memory_space<vmem>>, vector<4x32xbf16>
    %7 = arith.extf %6 : vector<4x32xbf16> to vector<4x32xf32>
    %8 = arith.addf %5, %7 : vector<4x32xf32>
    %c0_9 = arith.constant 0 : index
    %c0_10 = arith.constant 0 : index
    %9 = vector.load %arg3[%c0_9, %c0_10] : memref<1x32xbf16, #tpu.memory_space<vmem>>, vector<1x32xbf16>
    %10 = arith.extf %9 : vector<1x32xbf16> to vector<1x32xf32>
    %c0_11 = arith.constant 0 : index
    %c0_12 = arith.constant 0 : index
    %11 = vector.load %arg4[%c0_11, %c0_12] : memref<5x32xbf16, #tpu.memory_space<vmem>>, vector<1x32xbf16>
    %12 = arith.extf %11 : vector<1x32xbf16> to vector<1x32xf32>
    %13 = arith.addf %10, %12 : vector<1x32xf32>
    %cst_13 = arith.constant 0.000000e+00 : bf16
    %14 = vector.broadcast %cst_13 : bf16 to vector<3x32xbf16>
    %c0_14 = arith.constant 0 : index
    %c5 = arith.constant 5 : index
    %c0_15 = arith.constant 0 : index
    %15 = vector.load %arg7[%c0_14, %c5, %c0_15] : memref<1x8x32xbf16, #tpu.memory_space<vmem>>, vector<1x3x32xbf16>
    %16 = vector.shape_cast %15 : vector<1x3x32xbf16> to vector<3x32xbf16>
    %17 = vector.shape_cast %14 : vector<3x32xbf16> to vector<1x3x32xbf16>
    tpu.vector_store %arg7[%c0_14, %c5, %c0_15], %17 {strides = array<i32>} : memref<1x8x32xbf16, #tpu.memory_space<vmem>>, vector<1x3x32xbf16>,
    %cst_16 = arith.constant dense<0.000000e+00> : vector<1xf32>
    %18 = vector.multi_reduction <add>, %13, %cst_16 [1] : vector<1x32xf32> to vector<1xf32>
    %19 = vector.shape_cast %18 : vector<1xf32> to vector<1x1xf32>
    %cst_17 = arith.constant 3.200000e+01 : f32
    %20 = vector.broadcast %cst_17 : f32 to vector<1x1xf32>
    %21 = arith.divf %19, %20 : vector<1x1xf32>
    %22 = vector.broadcast %21 : vector<1x1xf32> to vector<1x32xf32>
    %23 = arith.subf %13, %22 : vector<1x32xf32>
    %24 = arith.mulf %23, %23 : vector<1x32xf32>
    %cst_18 = arith.constant dense<0.000000e+00> : vector<1xf32>
    %25 = vector.multi_reduction <add>, %24, %cst_18 [1] : vector<1x32xf32> to vector<1xf32>
    %26 = vector.shape_cast %25 : vector<1xf32> to vector<1x1xf32>
    %cst_19 = arith.constant 3.200000e+01 : f32
    %27 = vector.broadcast %cst_19 : f32 to vector<1x1xf32>
    %28 = arith.divf %26, %27 : vector<1x1xf32>
    %29 = vector.broadcast %21 : vector<1x1xf32> to vector<1x32xf32>
    %30 = arith.subf %13, %29 : vector<1x32xf32>
    %cst_20 = arith.constant 9.99999974E-6 : f32
    %31 = vector.broadcast %cst_20 : f32 to vector<1x1xf32>
    %32 = arith.addf %28, %31 : vector<1x1xf32>
    %33 = math.rsqrt %32 : vector<1x1xf32>
    %34 = vector.broadcast %33 : vector<1x1xf32> to vector<1x32xf32>
    %35 = arith.mulf %30, %34 : vector<1x32xf32>
    %36 = arith.extf %0 : vector<1x32xbf16> to vector<1x32xf32>
    %37 = arith.mulf %35, %36 : vector<1x32xf32>
    %38 = arith.extf %1 : vector<1x32xbf16> to vector<1x32xf32>
    %39 = arith.addf %37, %38 : vector<1x32xf32>
    %40 = arith.truncf %39 : vector<1x32xf32> to vector<1x32xbf16>
    %c0_21 = arith.constant 0 : index
    %c0_22 = arith.constant 0 : index
    %c0_23 = arith.constant 0 : index
    %41 = vector.load %arg7[%c0_21, %c0_22, %c0_23] : memref<1x8x32xbf16, #tpu.memory_space<vmem>>, vector<1x1x32xbf16>
    %42 = vector.shape_cast %41 : vector<1x1x32xbf16> to vector<1x32xbf16>
    %43 = vector.shape_cast %40 : vector<1x32xbf16> to vector<1x1x32xbf16>
    tpu.vector_store %arg7[%c0_21, %c0_22, %c0_23], %43 {strides = array<i32>} : memref<1x8x32xbf16, #tpu.memory_space<vmem>>, vector<1x1x32xbf16>,
    %cst_24 = arith.constant dense<0.000000e+00> : vector<4xf32>
    %44 = vector.multi_reduction <add>, %8, %cst_24 [1] : vector<4x32xf32> to vector<4xf32>
    %45 = vector.shape_cast %44 : vector<4xf32> to vector<4x1xf32>
    %cst_25 = arith.constant 3.200000e+01 : f32
    %46 = vector.broadcast %cst_25 : f32 to vector<4x1xf32>
    %47 = arith.divf %45, %46 : vector<4x1xf32>
    %48 = vector.broadcast %47 : vector<4x1xf32> to vector<4x32xf32>
    %49 = arith.subf %8, %48 : vector<4x32xf32>
    %50 = arith.mulf %49, %49 : vector<4x32xf32>
    %cst_26 = arith.constant dense<0.000000e+00> : vector<4xf32>
    %51 = vector.multi_reduction <add>, %50, %cst_26 [1] : vector<4x32xf32> to vector<4xf32>
    %52 = vector.shape_cast %51 : vector<4xf32> to vector<4x1xf32>
    %cst_27 = arith.constant 3.200000e+01 : f32
    %53 = vector.broadcast %cst_27 : f32 to vector<4x1xf32>
    %54 = arith.divf %52, %53 : vector<4x1xf32>
    %55 = vector.broadcast %47 : vector<4x1xf32> to vector<4x32xf32>
    %56 = arith.subf %8, %55 : vector<4x32xf32>
    %cst_28 = arith.constant 9.99999974E-6 : f32
    %57 = vector.broadcast %cst_28 : f32 to vector<4x1xf32>
    %58 = arith.addf %54, %57 : vector<4x1xf32>
    %59 = math.rsqrt %58 : vector<4x1xf32>
    %60 = vector.broadcast %59 : vector<4x1xf32> to vector<4x32xf32>
    %61 = arith.mulf %56, %60 : vector<4x32xf32>
    %62 = arith.extf %0 : vector<1x32xbf16> to vector<1x32xf32>
    %63 = vector.broadcast %62 : vector<1x32xf32> to vector<4x32xf32>
    %64 = arith.mulf %61, %63 : vector<4x32xf32>
    %65 = arith.extf %1 : vector<1x32xbf16> to vector<1x32xf32>
    %66 = vector.broadcast %65 : vector<1x32xf32> to vector<4x32xf32>
    %67 = arith.addf %64, %66 : vector<4x32xf32>
    %68 = arith.truncf %67 : vector<4x32xf32> to vector<4x32xbf16>
    %c0_29 = arith.constant 0 : index
    %c1_30 = arith.constant 1 : index
    %c0_31 = arith.constant 0 : index
    %69 = vector.load %arg7[%c0_29, %c1_30, %c0_31] : memref<1x8x32xbf16, #tpu.memory_space<vmem>>, vector<1x4x32xbf16>
    %70 = vector.shape_cast %69 : vector<1x4x32xbf16> to vector<4x32xbf16>
    %71 = vector.shape_cast %68 : vector<4x32xbf16> to vector<1x4x32xbf16>
    tpu.vector_store %arg7[%c0_29, %c1_30, %c0_31], %71 {strides = array<i32>} : memref<1x8x32xbf16, #tpu.memory_space<vmem>>, vector<1x4x32xbf16>,
    return
  }
  func.func @transform_0(%arg0: i32) -> (i32, i32, i32) {
    %c0_i32 = arith.constant 0 : i32
    %c0_i32_0 = arith.constant 0 : i32
    %c0_i32_1 = arith.constant 0 : i32
    return %arg0, %c0_i32, %c0_i32_0 : i32, i32, i32
  }
  func.func @transform_1(%arg0: i32) -> (i32, i32) {
    %c0_i32 = arith.constant 0 : i32
    %c0_i32_0 = arith.constant 0 : i32
    %c0_i32_1 = arith.constant 0 : i32
    return %c0_i32, %c0_i32_0 : i32, i32
  }
  func.func @transform_2(%arg0: i32) -> (i32, i32) {
    %c0_i32 = arith.constant 0 : i32
    %c0_i32_0 = arith.constant 0 : i32
    %c0_i32_1 = arith.constant 0 : i32
    return %c0_i32, %c0_i32_0 : i32, i32
  }
  func.func @transform_3(%arg0: i32) -> (i32, i32) {
    %c0_i32 = arith.constant 0 : i32
    %c0_i32_0 = arith.constant 0 : i32
    %c0_i32_1 = arith.constant 0 : i32
    return %c0_i32, %c0_i32_0 : i32, i32
  }
  func.func @transform_4(%arg0: i32) -> (i32, i32) {
    %c0_i32 = arith.constant 0 : i32
    %c0_i32_0 = arith.constant 0 : i32
    %c0_i32_1 = arith.constant 0 : i32
    return %c0_i32, %c0_i32_0 : i32, i32
  }
  func.func @transform_5(%arg0: i32) -> (i32, i32) {
    %c0_i32 = arith.constant 0 : i32
    %c0_i32_0 = arith.constant 0 : i32
    %c0_i32_1 = arith.constant 0 : i32
    return %c0_i32, %c0_i32_0 : i32, i32
  }
  func.func @transform_6(%arg0: i32) -> (i32, i32, i32) {
    %c0_i32 = arith.constant 0 : i32
    %c0_i32_0 = arith.constant 0 : i32
    %c0_i32_1 = arith.constant 0 : i32
    return %arg0, %c0_i32, %c0_i32_0 : i32, i32, i32
  }
}

</mosaic_0001>

<bundles_post_ra>
// kernel: tpu_custom_call.1
= control target key start
LH: loop header
LB: loop body
LE: loop exit
PB: predicated region body
PF: predicated region fallthrough
CT: control target
= control target key end

     0   :  { %11 = vsyncpa [#allocation3], 0  ;;  %s906_s0 = inlined_call_operand.vmem [shape: bf16[2,4,192], index: 0, kind: input, shape index: {}]   ;;  %s907_s1 = inlined_call_operand.vmem [shape: bf16[192,32], index: 1, kind: input, shape index: {}]   ;;  %s908_s2 = inlined_call_operand.vmem [shape: bf16[1,32], index: 2, kind: input, shape index: {}]   ;;  %s909_s3 = inlined_call_operand.vmem [shape: bf16[5,32], index: 3, kind: input, shape index: {}]   ;;  %s910_s4 = inlined_call_operand.vmem [shape: bf16[1,32], index: 4, kind: input, shape index: {}]   ;;  %s911_s5 = inlined_call_operand.vmem [shape: bf16[1,32], index: 5, kind: input, shape index: {}]   ;;  %s912_s6 = inlined_call_operand.hbm [shape: bf16[2,8,32], index: 6, kind: output, shape index: {}]  }
   0x1   :  { %13 = vsyncpa [#allocation3 + $0x1], 0  ;;  %s744_s21 = smov 0   ;;  %s746_s22 = smov 0  }
   0x2   :  { %s748_s23 = smov 0   ;;  %s750_s24 = smov 0  }
   0x3 LB: > { %s765_s25 = sadd.s32 4294967295, %s705_s24   ;;  %s561_s26 = sadd.s32 4294967294, %s705_s24   ;;  %s705_s24 = sphi %s750_s24, %s918_s24   ;;  %s701_s23 = sphi %s748_s23, %s917_s23   ;;  %s697_s22 = sphi %s746_s22, %s916_s22   ;;  %s693_s21 = sphi %s744_s21, %s915_s21  }
   0x4   : > { %s769_s27 = sadd.s32 1, %s705_s24   ;;  %s157_s28 = sadd.s32 1, %s701_s23 }
   0x5   : > { %s154_s29 = ssub.s32 %s705_s24, %s769_s27  ;;  %p167_p0 = scmp.ne.s32.totalorder %s701_s23, %s697_s22 }
   0x6   : > { %p155_p1 = scmp.eq.s32.totalorder %s154_s29, 0  ;;  %p168_p2 = scmp.eq.s32.totalorder %s765_s25, 1 }
   0x7   : > { %p173_p3 = scmp.ne.s32.totalorder %s697_s22, %s693_s21  ;;  %p174_p4 = scmp.eq.s32.totalorder %s561_s26, 1 }
   0x8   : > { %s780_s30 = scalar_select %p155_p1, %s701_s23, %s157_s28  }
   0x9   : > { %p782_p5 = por %p168_p2, %p167_p0  ;;  %p786_p6 = por %p174_p4, %p173_p3 }
   0xa   : > { %p564_p7 = scmp.ge.s32.totalorder %s705_s24, 1  ;;  %p215_p8 = scmp.lt.s32.totalorder %s705_s24, 3 }
   0xc   : > { %p216_p9 = pnand %p564_p7, %p215_p8 }
   0xd   : > { %p245_p10 = scmp.lt.s32.totalorder (!%p216_p9), %s765_s25, 1  ;;  %s242_s14 = sand.u32 (!%p216_p9), 1, %s697_s22  }
   0xe   : > { %219 = sbr.rel (%p216_p9) target bundleno = 593 (0x251), region = 44  ;;  %s565_s15 = sshll.u32 (!%p216_p9), %s242_s14, 2 }
   0xf   : > { %s584_s26 = sshll.u32 (!%p216_p9), %s765_s25, 6  ;;  %s489_s11 = scalar_lea.sflag (!%p216_p9), [#allocation3], %s242_s14 }
  0x10   : > { %s868_s10 = scalar_lea.hbm (!%p216_p9), %s912_s6, %s584_s26 }
  0x13   : > { %v629_v0 = vld [vmem:[%s907_s1 + $0x38] sm:$0xff]   ;;  %v707_v1 = vmov 0   ;;  %v630_v2 = vld [vmem:[%s907_s1 + $0x30] sm:$0xff]   ;;  %s246_s13 = scalar_select %p245_p10, %s765_s25, 1  ;;  %v631_v3 = vld [vmem:[%s907_s1 + $0x28] sm:$0xff]   ;;  %vm365_vm0 = vcmask 523264   ;;  %v460_v59 = vlaneseq }
  0x14   : > { %369 = vmatprep.subr.bf16.mxu0 %v707_v1  ;;  %v632_v4 = vld [vmem:[%s907_s1 + $0x20] sm:$0xff]   ;;  %v633_v10 = vld [vmem:[%s907_s1 + $0x18] sm:$0xff]   ;;  %vm420_vm1 = vcmask 253952   ;;  %v634_v13 = vld [vmem:[%s907_s1 + $0x10] sm:$0xff]   ;;  %vm446_vm2 = vcmask 257024   ;;  %vm414_vm3 = vcmask 257026  }
  0x15   : > { %370 = vmatpush1.bf16.msra.mxu0 %v629_v0  ;;  %s587_s16 = sshll.u32 %s246_s13, 2  ;;  %v409_v6 = vld [vmem:[%s908_s2] sm:$0x1]  ;;  %v635_v15 = vld [vmem:[%s907_s1 + $0x8] sm:$0xff]   ;;  %v637_v17 = vld [vmem:[%s907_s1 + $0x58] sm:$0xff]   ;;  %v461_v60 = vshrl.u32 %v460_v59, 7 }
  0x16   : > { %371 = vmatprep.subr.bf16.mxu0 %v707_v1  ;;  %s249_s19 = scalar_lea.vmem %s906_s0, %s587_s16  ;;  %v410_v8 = vunpack.c.l.bf16 %v409_v6  ;;  %v411_v9 = vld [vmem:[%s909_s3] sm:$0x1]  ;;  %v638_v18 = vld [vmem:[%s907_s1 + $0x50] sm:$0xff]   ;;  %v639_v19 = vld [vmem:[%s907_s1 + $0x48] sm:$0xff]   ;;  %vm415_vm4 = vsmask.f32 7946 }
  0x17   : > { %v568_v5 = vld.sshfl [vmem:[%s249_s19] sm:$0x33 pattern:$0x76325410]  ;;  %v412_v11 = vunpack.c.l.bf16 %v411_v9  ;;  %vm416_vm5 = vmand %vm414_vm3, %vm415_vm4  ;;  %s848_s16 = scalar_lea.vmem [#allocation2], %s565_s15  ;;  %v462_v61 = vsub.s32 0, %v461_v60 }
  0x18   : > { %v288_v7 = vcombine.high %v568_v5, %v568_v5  ;;  %v636_v16 = vld [vmem:[%s907_s1] sm:$0xff]   ;;  %vm441_vm6 = vsmask.f32 256  ;;  %vm482_vm8 = vcmask 256000   ;;  %vm483_vm9 = vsmask.f32 2306 }
  0x19   : > { %372 = vmatpush1.bf16.msra.mxu0 %v630_v2  ;;  %v413_v12 = vadd.f32 %v412_v11, %v410_v8  ;;  %v640_v20 = vld [vmem:[%s907_s1 + $0x40] sm:$0xff]   ;;  %vm442_vm7 = vmand %vm420_vm1, %vm441_vm6  ;;  %s502_s28 = sshll.u32 %s848_s16, 4  ;;  %s708_s25 = smov [#allocation2]   ;;  %s503_s28 = int_to_ptr.vmem [resolvable:$true] %s502_s28 }
  0x1a   : > { %373 = vmatprep.subr.bf16.mxu0 %v707_v1  ;;  %581 = vmatprep.mubr.msk.bf16.mxu0 %vm365_vm0, %v288_v7  ;;  %v278_v26 = vld [vmem:[%s909_s3] sm:$0x7]  ;;  %vm484_vm10 = vmand %vm482_vm8, %vm483_vm9  ;;  %s645_s12 = scalar_lea.vmem %s503_s28, 64  ;;  %s649_s13 = sshll.u32 %s708_s25, 4  ;;  %s650_s13 = int_to_ptr.vmem [resolvable:$false] %s649_s13 }
  0x1b   : > { %v421_v14 = vsel %vm420_vm1, %v413_v12, 0.0  ;;  %v279_v27 = vunpack.c.l.bf16 %v278_v26  ;;  %v417_v35 = vld [vmem:[%s848_s16] sm:$0xc]  ;;  %v251_v40 = vld [vmem:[%s910_s4] sm:$0x1]  ;;  %p646_p11 = scmp.ne.s32.totalorder %s503_s28, %s645_s12  ;;  %s651_s15 = scalar_lea.vmem %s650_s13, 128 }
  0x1c   : > { %422 = vadd.xlane.f32.xlu0 %v421_v14  ;;  %v418_v36 = vsel %vm416_vm5, 0, %v417_v35  ;;  %v252_v41 = vld [vmem:[%s911_s5] sm:$0x1]  ;;  %v435_v42 = vunpack.c.l.bf16 %v251_v40  ;;  %p652_p0 = scmp.lt.s32.totalorder %s503_s28, %s650_s13  ;;  %p653_p1 = scmp.lt.s32.totalorder %s651_s15, %s645_s12 }
  0x1d   : > { %374 = vmatpush1.bf16.msra.mxu0 %v631_v3  ;;  %v363_v28 = vrot.slane %v279_v27, 1  ;;  %419 = vst [vmem:[%s848_s16] sm:$0xc] %v418_v36  ;;  %v437_v45 = vunpack.c.l.bf16 %v252_v41  ;;  %v443_v48 = vld [vmem:[%s848_s16] sm:$0x1]  ;;  %p647_p12 = pnand %p646_p11, %p782_p5 }
  0x1e   : > { %375 = vmatprep.subr.bf16.mxu0 %v707_v1  ;;  %v463_v62 = vrot.slane %v435_v42, %v462_v61  ;;  %p654_p2 = por %p653_p1, %p652_p0 }
  0x1f   : > { %v468_v0 = vrot.slane %v437_v45, %v462_v61  ;;  %p648_p13 = pneg %p647_p12 }
  0x21   : > { %376 = vmatpush1.bf16.msra.mxu0 %v632_v4  ;;  %p655_p3 = pnand %p654_p2, %p648_p13 }
  0x22   : > { %377 = vmatprep.subr.bf16.mxu0 %v707_v1 }
  0x25   : > { %378 = vmatpush1.bf16.msra.mxu0 %v633_v10 }
  0x26   : > { %379 = vmatprep.subr.bf16.mxu0 %v707_v1 }
  0x29   : > { %380 = vmatpush1.bf16.msra.mxu0 %v634_v13 }
  0x2a   : > { %381 = vmatprep.subr.bf16.mxu0 %v707_v1 }
  0x2d   : > { %382 = vmatpush1.bf16.msra.mxu0 %v635_v15 }
  0x2e   : > { %383 = vmatprep.subr.bf16.mxu0 %v707_v1 }
  0x31   : > { %384 = vmatpush1.bf16.msra.mxu0 %v636_v16 }
  0x32   : > { %393 = vmatprep.subr.bf16.mxu0 %v707_v1 }
  0x35   : > { %394 = vmatpush2.bf16.msra.mxu0 %v637_v17 }
  0x36   : > { %395 = vmatprep.subr.bf16.mxu0 %v707_v1 }
  0x39   : > { %396 = vmatpush2.bf16.msra.mxu0 %v638_v18 }
  0x3a   : > { %397 = vmatprep.subr.bf16.mxu0 %v707_v1 }
  0x3d   : > { %398 = vmatpush2.bf16.msra.mxu0 %v639_v19 }
  0x3e   : > { %399 = vmatprep.subr.bf16.mxu0 %v707_v1 }
  0x41   : > { %400 = vmatpush2.bf16.msra.mxu0 %v640_v20 }
  0x44   : > { %402 = vmatmul.mubr.bf16.vlgmr.msra.gmra.mxu0 %v568_v5 }
  0xa5   : > { %v423_v21 = vpop.xlane.xlu0 %422 }
  0xa6   : > { %v425_v22 = vmul.f32 0.03125, %v423_v21 }
  0xa8   : > { %v426_v23 = vsub.f32 %v413_v12, %v425_v22 }
  0xaa   : > { %v427_v24 = vmul.f32 %v426_v23, %v426_v23 }
  0xac   : > { %v428_v25 = vsel %vm420_vm1, %v427_v24, 0.0 }
  0xad   : > { %429 = vadd.xlane.f32.xlu1 %v428_v25 }
 0x104   : > { %v403_v29 = vpop.f32.mrf.mxu0 }
 0x105   : > { %v404_v30 = vadd.f32 %v403_v29, %v363_v28 }
 0x106   : > { %v405_v31 = vpop.f32.mrf.mxu0 }
 0x107   : > { %v447_v32 = vsel %vm446_vm2, %v404_v30, 0.0 }
 0x108   : > { %v406_v33 = vpop.f32.mrf.mxu0  ;;  %448 = vadd.xlane.f32.xlu0 %v447_v32 }
 0x10a   : > { %v407_v34 = vpop.f32.mrf.mxu0 }
 0x136   : > { %v430_v37 = vpop.xlane.xlu1 %429 }
 0x137   : > { %v431_v38 = vmul.f32 0.03125, %v430_v37 }
 0x139   : > { %v432_v39 = vadd.f32 1e-05, %v431_v38 }
 0x13b   : > { %641 = vrsqrt.f32 %v432_v39 }
 0x148   : > { %v642_v43 = vpop.eup %641 }
 0x149   : > { %v434_v44 = vmul.f32 %v642_v43, %v426_v23 }
 0x14b   : > { %v436_v46 = vmul.f32 %v435_v42, %v434_v44 }
 0x14d   : > { %v438_v47 = vadd.f32 %v437_v45, %v436_v46 }
 0x14f   : > { %v439_v49 = vpack.c.bf16 %v438_v47, %v438_v47 }
 0x151   : > { %v444_v50 = vsel %vm442_vm7, %v439_v49, %v443_v48 }
 0x152   : > { %445 = vst [vmem:[%s848_s16] sm:$0x1] %v444_v50 }
 0x159   : > { %v485_v9 = vld [vmem:[%s848_s16] sm:$0x7] }
 0x191   : > { %v449_v51 = vpop.xlane.xlu0 %448 }
 0x192   : > { %v450_v52 = vmul.f32 0.03125, %v449_v51 }
 0x194   : > { %v451_v53 = vsub.f32 %v404_v30, %v450_v52 }
 0x196   : > { %v452_v54 = vmul.f32 %v451_v53, %v451_v53 }
 0x198   : > { %v453_v55 = vsel %vm446_vm2, %v452_v54, 0.0 }
 0x199   : > { %454 = vadd.xlane.f32.xlu1 %v453_v55 }
 0x222   : > { %v455_v56 = vpop.xlane.xlu1 %454 }
 0x223   : > { %v456_v57 = vmul.f32 0.03125, %v455_v56 }
 0x225   : > { %v457_v58 = vadd.f32 1e-05, %v456_v57 }
 0x227   : > { %643 = vrsqrt.f32 %v457_v58 }
 0x234   : > { %v644_v63 = vpop.eup %643 }
 0x235   : > { %v459_v1 = vmul.f32 %v644_v63, %v451_v53 }
 0x237   : > { %v464_v2 = vmul.f32 %v463_v62, %v459_v1 }
 0x239   : > { %v469_v3 = vadd.f32 %v468_v0, %v464_v2 }
 0x23b   : > { %v588_v4 = vpack.c.bf16 %v469_v3, %v469_v3 }
 0x23d   : > { %v475_v5 = vshrl.u32 %v588_v4, 16  ;;  %v478_v7 = vshll.u32 %v588_v4, 16 }
 0x23f   : > { %v477_v6 = vrot.slane %v475_v5, 7 }
 0x241   : > { %v480_v8 = vor.u32 %v478_v7, %v477_v6 }
 0x243   : > { %v486_v10 = vsel %vm484_vm10, %v480_v8, %v485_v9 }
 0x244   : > { %487 = vst [vmem:[%s848_s16] sm:$0x7] %v486_v10 }
 0x245   : > { %658 = shalt.err (!%p655_p3)
}
 0x246   : > { %s659_s16 = scalar_lea.hbm %s868_s10, 64  ;;  %s663_s18 = scalar_lea.hbm %s912_s6, 128 }
 0x247   : > { %p660_p4 = scmp.ne.s32.totalorder %s868_s10, %s659_s16  ;;  %p664_p9 = scmp.lt.s32.totalorder %s868_s10, %s912_s6 }
 0x248   : > { %p665_p10 = scmp.lt.s32.totalorder %s663_s18, %s659_s16 }
 0x249   : > { %p661_p7 = pnand %p660_p4, %p782_p5 }
 0x24a   : > { %p666_p11 = por %p665_p10, %p664_p9 }
 0x24b   : > { %p662_p8 = pneg %p661_p7 }
 0x24d   : > { %p667_p12 = pnand %p666_p11, %p662_p8 }
 0x24f   : > { %670 = shalt.err (!%p667_p12)
}
 0x250   : > { %589 = dma.vmem_to_hbm [thread:$0]  (%p782_p5), %s503_s28, 64, %s868_s10, %s489_s11  }
 0x251 PF: > { %p595_p13 = scmp.ge.s32.totalorder %s705_s24, 2  ;;  %s514_s26 = sand.u32 1, %s693_s21  }
 0x252   : > { %s515_s29 = scalar_lea.sflag [#allocation3], %s514_s26 }
 0x253   : > { %p592_p0 = pnand %p595_p13, %p786_p6 }
 0x255   : > { %p593_p1 = pneg %p592_p0 }
 0x257   : > { %688 = dma.done.wait (%p593_p1), %s515_s29, 64  }
 0x258   : > { %690 = vsyncadd (%p593_p1), %s515_s29, 4294967232  ;;  %p16_p2 = scmp.ge.s32.totalorder %s769_s27, 4   ;;  %s915_s21 = smov %s697_s22 }
 0x259   : > { %s916_s22 = smov %s701_s23  ;;  %s917_s23 = smov %s780_s30 }
 0x25a   : > { %s918_s24 = smov %s769_s27  ;;  %18 = sbr.rel (!%p16_p2) target bundleno = 3 (0x3), region = 79 }
 0x25f   :  { %520 = vsyncpa [#allocation3], 1 }
 0x260   :  { %522 = vsyncpa [#allocation3 + $0x1], 1 }

</bundles_post_ra>
